<compile_context>
chip_gen: v5e
topology: v5e:2x2
jax: 0.10.0
libtpu: 0.0.40
codegen_flags: <defaults>
</compile_context>

<pallas_src>
import jax
import jax.numpy as jnp
from jax.experimental import pallas as pl
from jax.experimental.pallas import tpu as pltpu

HIDDEN = 1024
CLASS_NUM = 50
N_PAD = 128            # lane-dense padded class dim (one full 128-lane vreg)
TB_MAX = 1024          # batch tile cap: 4 MiB f32 per activation buffer
MIN_PALLAS_BATCH = 64  # below this, plain XLA dot beats pallas launch overhead


def _round_up(x, m):
    return ((x + m - 1) // m) * m


def _sn_fc_kernel(x_ref, w_ref, b_ref, o_ref):
    # x_ref: (TB, HIDDEN) f32     w_ref: (HIDDEN, N_PAD) bf16
    # b_ref: (1, N_PAD) f32       o_ref: (TB, N_PAD) bf16
    x = x_ref[...].astype(jnp.bfloat16)  # cast in-kernel; hides under the DMA
    acc = jnp.dot(x, w_ref[...], preferred_element_type=jnp.float32)
    o_ref[...] = (acc + b_ref[...]).astype(o_ref.dtype)


def prepare_fc_params(weight, bias):
    """One-time param prep (outside jit): PyTorch nn.Linear layout
    weight (CLASS_NUM, HIDDEN) f32, bias (CLASS_NUM,) f32
    -> weight (HIDDEN, N_PAD) bf16 (zero-padded), bias (1, N_PAD) f32.
    Padded class columns 50..127 are exactly 0; downstream argmax/softmax
    must use only the [:, :CLASS_NUM] slice returned by sn_fc_forward."""
    w_kn = jnp.zeros((HIDDEN, N_PAD), dtype=jnp.bfloat16)
    w_kn = w_kn.at[:, :CLASS_NUM].set(weight.T.astype(jnp.bfloat16))
    b_pn = jnp.zeros((1, N_PAD), dtype=jnp.float32)
    b_pn = b_pn.at[:, :CLASS_NUM].set(bias.astype(jnp.float32).reshape(1, -1))
    return w_kn, b_pn


@jax.jit
def _sn_fc_pallas(features, w_kn, b_pn):
    B, H = features.shape
    assert H == HIDDEN

    # Batch tile: multiple of 8, at least 2 grid steps when possible (so the
    # "parallel" batch axis can shard across v7x's two TensorCores), capped at
    # TB_MAX rows to keep double-buffered VMEM use ~9 MiB (fits every gen).
    tb = min(TB_MAX, max(8, _round_up(pl.cdiv(B, 2), 8)))
    grid = (pl.cdiv(B, tb),)  # ragged last block; OOB output rows are dropped

    cost = pl.CostEstimate(
        flops=2 * B * HIDDEN * N_PAD,
        transcendentals=0,
        bytes_accessed=(
            B * HIDDEN * 4        # f32 activations read
            + HIDDEN * N_PAD * 2  # bf16 weight (resident)
            + N_PAD * 4           # f32 bias
            + B * N_PAD * 2       # bf16 output write
        ),
    )

    out = pl.pallas_call(
        _sn_fc_kernel,
        out_shape=jax.ShapeDtypeStruct((B, N_PAD), jnp.bfloat16),
        grid_spec=pltpu.PrefetchScalarGridSpec(
            num_scalar_prefetch=0,
            grid=grid,
            in_specs=[
                pl.BlockSpec((tb, HIDDEN), lambda i: (i, 0)),     # batch tile
                pl.BlockSpec((HIDDEN, N_PAD), lambda i: (0, 0)),  # resident W
                pl.BlockSpec((1, N_PAD), lambda i: (0, 0)),       # resident b
            ],
            out_specs=pl.BlockSpec((tb, N_PAD), lambda i: (i, 0)),
        ),
        compiler_params=pltpu.CompilerParams(
            dimension_semantics=("parallel",),   # megacore sharding on v7x
            vmem_limit_bytes=32 * 1024 * 1024,
        ),
        cost_estimate=cost,
    )(features, w_kn, b_pn)

    # Only the class-column slice remains (small copy); batch is not padded.
    return out[:, :CLASS_NUM]


@jax.jit
def _sn_fc_xla(features, w_kn, b_pn):
    # Tiny-batch fast path: a single fused XLA dot; same math as the kernel.
    acc = jnp.dot(features.astype(jnp.bfloat16), w_kn,
                  preferred_element_type=jnp.float32)
    return (acc + b_pn).astype(jnp.bfloat16)[:, :CLASS_NUM]


def sn_fc_forward(features, w_kn, b_pn):
    """features: (B, 1024) f32 (sn_model output); w_kn/b_pn from
    prepare_fc_params. Returns (B, CLASS_NUM) bf16 logits (f32-accumulated)."""
    if features.shape[0] < MIN_PALLAS_BATCH:
        return _sn_fc_xla(features, w_kn, b_pn)
    return _sn_fc_pallas(features, w_kn, b_pn)


if __name__ == "__main__":
    key = jax.random.PRNGKey(0)
    k_feat, k_w, k_b = jax.random.split(key, 3)

    B = 256  # big enough to exercise the Pallas path (2 grid steps of 128)

    # Placeholder for sn_model(names, descriptions) output: (B, 1024) features.
    features = jax.random.normal(k_feat, (B, HIDDEN), dtype=jnp.float32)

    # Deterministic Linear(1024 -> 50) parameters (PyTorch nn.Linear layout).
    bound = 1.0 / jnp.sqrt(jnp.float32(HIDDEN))
    weight = jax.random.uniform(
        k_w, (CLASS_NUM, HIDDEN), minval=-bound, maxval=bound,
        dtype=jnp.float32)
    bias = jax.random.uniform(
        k_b, (CLASS_NUM,), minval=-bound, maxval=bound, dtype=jnp.float32)

    # One-time param prep outside the jitted forward (no per-call transpose).
    w_kn, b_pn = prepare_fc_params(weight, bias)

    out = sn_fc_forward(features, w_kn, b_pn)
    jax.block_until_ready(out)

    # Sanity check against plain-JAX f32 reference.
    # bf16 inputs/weights/output give ~1e-2 relative error on logits vs the
    # PyTorch f32 nn.Linear -- fine for classification, hence the loose tol.
    ref = features @ weight.T + bias
    assert out.shape == (B, CLASS_NUM)
    assert jnp.allclose(out.astype(jnp.float32), ref, atol=5e-2, rtol=5e-2)

    print("KERNEL_OK")
</pallas_src>

<mosaic_0001>
module attributes {stable_mosaic.version = 11 : i64} {
  func.func @_sn_fc_kernel(%arg0: i32, %arg1: memref<128x1024xf32, #tpu.memory_space<vmem>>, %arg2: memref<1024x128xbf16, #tpu.memory_space<vmem>>, %arg3: memref<1x128xf32, #tpu.memory_space<vmem>>, %arg4: memref<128x128xbf16, #tpu.memory_space<vmem>>) attributes {dimension_semantics = [#tpu.dimension_semantics<parallel>], iteration_bounds = array<i64: 2>, scalar_prefetch = 0 : i64, scratch_operands = 0 : i64, tpu.core_type = #tpu.core_type<tc>, window_params = [{transform_indices = @transform_0, window_bounds = array<i64: 128, 1024>}, {pipeline_mode = #tpu.pipeline_mode<synchronous>, transform_indices = @transform_1, window_bounds = array<i64: 1024, 128>}, {pipeline_mode = #tpu.pipeline_mode<synchronous>, transform_indices = @transform_2, window_bounds = array<i64: 1, 128>}, {transform_indices = @transform_3, window_bounds = array<i64: 128, 128>}]} {
    %c0 = arith.constant 0 : index
    %c0_0 = arith.constant 0 : index
    %0 = vector.load %arg1[%c0, %c0_0] : memref<128x1024xf32, #tpu.memory_space<vmem>>, vector<128x1024xf32>
    %1 = arith.truncf %0 : vector<128x1024xf32> to vector<128x1024xbf16>
    %c0_1 = arith.constant 0 : index
    %c0_2 = arith.constant 0 : index
    %2 = vector.load %arg2[%c0_1, %c0_2] : memref<1024x128xbf16, #tpu.memory_space<vmem>>, vector<1024x128xbf16>
    %cst = arith.constant dense<0.000000e+00> : vector<128x128xf32>
    %3 = tpu.matmul %1, %2, %cst {dimension_numbers = #tpu.dot_dimension_numbers<[1], [0], [0], [1], [0, 0, 1, 1], [], []>} : vector<128x1024xbf16>, vector<1024x128xbf16>, vector<128x128xf32> -> vector<128x128xf32>
    %c0_3 = arith.constant 0 : index
    %c0_4 = arith.constant 0 : index
    %4 = vector.load %arg3[%c0_3, %c0_4] : memref<1x128xf32, #tpu.memory_space<vmem>>, vector<1x128xf32>
    %5 = vector.broadcast %4 : vector<1x128xf32> to vector<128x128xf32>
    %6 = arith.addf %3, %5 : vector<128x128xf32>
    %7 = arith.truncf %6 : vector<128x128xf32> to vector<128x128xbf16>
    %c0_5 = arith.constant 0 : index
    %c0_6 = arith.constant 0 : index
    %8 = vector.load %arg4[%c0_5, %c0_6] : memref<128x128xbf16, #tpu.memory_space<vmem>>, vector<128x128xbf16>
    tpu.vector_store %arg4[%c0_5, %c0_6], %7 {strides = array<i32>} : memref<128x128xbf16, #tpu.memory_space<vmem>>, vector<128x128xbf16>,
    return
  }
  func.func @transform_0(%arg0: i32) -> (i32, i32) {
    %c0_i32 = arith.constant 0 : i32
    %c0_i32_0 = arith.constant 0 : i32
    return %arg0, %c0_i32 : i32, i32
  }
  func.func @transform_1(%arg0: i32) -> (i32, i32) {
    %c0_i32 = arith.constant 0 : i32
    %c0_i32_0 = arith.constant 0 : i32
    %c0_i32_1 = arith.constant 0 : i32
    return %c0_i32, %c0_i32_0 : i32, i32
  }
  func.func @transform_2(%arg0: i32) -> (i32, i32) {
    %c0_i32 = arith.constant 0 : i32
    %c0_i32_0 = arith.constant 0 : i32
    %c0_i32_1 = arith.constant 0 : i32
    return %c0_i32, %c0_i32_0 : i32, i32
  }
  func.func @transform_3(%arg0: i32) -> (i32, i32) {
    %c0_i32 = arith.constant 0 : i32
    %c0_i32_0 = arith.constant 0 : i32
    return %arg0, %c0_i32 : i32, i32
  }
}

</mosaic_0001>

<bundles_post_ra>
// kernel: _sn_fc_pallas.1
= control target key start
LH: loop header
LB: loop body
LE: loop exit
PB: predicated region body
PF: predicated region fallthrough
CT: control target
= control target key end

     0   :  { %8 = vsyncpa [#allocation3], 0  ;;  %s2303_s0 = inlined_call_operand.hbm [shape: f32[256,1024], index: 0, kind: input, shape index: {}]   ;;  %s2304_s1 = inlined_call_operand.hbm [shape: bf16[1024,128], index: 1, kind: input, shape index: {}]   ;;  %s2305_s2 = inlined_call_operand.vmem [shape: f32[1,128], index: 2, kind: input, shape index: {}]   ;;  %s2306_s3 = inlined_call_operand.vmem [shape: bf16[256,128], index: 3, kind: output, shape index: {}]  }
   0x1   :  { %10 = vsyncpa [#allocation3 + $0x1], 0 }
   0x2   :  { %11 = vsyncpa [#allocation5], 0  ;;  %s1985_s12 = smov 0   ;;  %s1987_s13 = smov 0  }
   0x3   :  { %s1989_s14 = smov 0   ;;  %s1991_s15 = smov 0  }
   0x4 LB: > { %s1422_s16 = sadd.s32 4294967295, %s1959_s15   ;;  %p37_p0 = scmp.ne.s32.totalorder %s1951_s13, %s1947_s12  ;;  %s1959_s15 = sphi %s1991_s15, %s2314_s15   ;;  %s1955_s14 = sphi %s1989_s14, %s2313_s14   ;;  %s1951_s13 = sphi %s1987_s13, %s2312_s13   ;;  %s1947_s12 = sphi %s1985_s12, %s2311_s12  }
   0x5   : > { %p2007_p1 = scmp.eq.s32.totalorder %s1422_s16, 0  ;;  %p1424_p2 = scmp.ge.s32.totalorder %s1959_s15, 1 }
   0x6   : > { %p116_p3 = scmp.lt.s32.totalorder %s1959_s15, 3  ;;  %s127_s21 = sshll.u32 %s2304_s1, 4  ;;  %s128_s21 = int_to_ptr.hbm [resolvable:$true] %s127_s21 }
   0x7   : > { %p2015_p4 = por %p2007_p1, %p37_p0  ;;  %s1961_s23 = smov [#allocation4]  }
   0x8   : > { %p2022_p5 = pnand %p1424_p2, %p116_p3  ;;  %s129_s24 = sshll.u32 %s1961_s23, 4  ;;  %s130_s24 = int_to_ptr.vmem [resolvable:$true] %s129_s24 }
   0x9   : > { %s2031_s25 = sadd.s32 1, %s1959_s15   ;;  %s1962_s26 = smov 64  }
   0xa   : > { %p1813_p6 = pneg %p2022_p5  ;;  %s1963_s27 = smov 4  }
   0xb   : > { %s21_s28 = ssub.s32 %s1959_s15, %s2031_s25  ;;  %s24_s29 = sadd.s32 1, %s1955_s14 }
   0xc   : > { %p1814_p7 = pnand %p1813_p6, %p2007_p1  ;;  %p22_p8 = scmp.eq.s32.totalorder %s21_s28, 0 }
   0xd   : > { %p31_p9 = scmp.ne.s32.totalorder %s1955_s14, %s1951_s13  ;;  %p32_p10 = scmp.eq.s32.totalorder %s1959_s15, 0 }
   0xe   : > { %1816 = dma.hbm_to_vmem [thread:$0]  (!%p1814_p7), %s128_s21, 8192, %s130_s24, [#allocation5], %s1962_s26, %s1962_s26, %s1963_s27  }
   0xf   : > { %p1822_p11 = scmp.lt.s32.totalorder %s1959_s15, 2  ;;  %p33_p12 = por %p32_p10, %p31_p9 }
  0x10   : > { %s2043_s30 = scalar_select %p22_p8, %s1955_s14, %s24_s29  }
  0x11   : > { %s146_s4 = sand.u32 1, %s1955_s14   ;;  %s1695_s6 = sshll.u32 %s1959_s15, 10 }
  0x12   : > { %s1427_s5 = sshll.u32 %s146_s4, 10  ;;  %s156_s9 = scalar_lea.hbm %s2303_s0, %s1695_s6 }
  0x13   : > { %s150_s10 = scalar_lea.vmem [#allocation2], %s1427_s5  ;;  %s157_s12 = sshll.u32 %s156_s9, 4  ;;  %s158_s12 = int_to_ptr.hbm [resolvable:$true] %s157_s12 }
  0x14   : > { %s159_s11 = sshll.u32 %s150_s10, 4  ;;  %p2050_p13 = pnand %p1822_p11, %p33_p12  ;;  %s160_s11 = int_to_ptr.vmem [resolvable:$true] %s159_s11 }
  0x15   : > { %s147_s20 = scalar_lea.sflag [#allocation3], %s146_s4  ;;  %s1891_s21 = sshra.s32 %s158_s12, 4  ;;  %s1892_s21 = int_to_ptr.hbm [resolvable:$true] %s1891_s21 }
  0x16   : > { %s1893_s23 = scalar_lea.hbm %s1892_s21, 1024  ;;  %p1895_p2 = pneg %p2050_p13 }
  0x17   : > { %p1894_p0 = scmp.ne.s32.totalorder %s1892_s21, %s1893_s23  ;;  %s1898_s28 = scalar_lea.hbm %s2303_s0, 2048 }
  0x18   : > { %p1899_p7 = scmp.lt.s32.totalorder %s1892_s21, %s2303_s0  ;;  %p1900_p8 = scmp.lt.s32.totalorder %s1898_s28, %s1893_s23 }
  0x19   : > { %p1896_p3 = pnand %p1895_p2, %p1894_p0 }
  0x1a   : > { %p1901_p9 = por %p1900_p8, %p1899_p7 }
  0x1b   : > { %p1897_p6 = pneg %p1896_p3 }
  0x1d   : > { %p1902_p10 = pnand %p1901_p9, %p1897_p6 }
  0x1f   : > { %1905 = shalt.err (!%p1902_p10)
}
  0x20   : > { %s1964_s4 = smov 1024   ;;  %171 = sbr.rel (%p2022_p5) target bundleno = 461 (0x1cd), region = 32 }
  0x21   : > { %1820 = dma.hbm_to_vmem [thread:$0]  (!%p2050_p13), %s158_s12, 16384, %s160_s11, %s147_s20, %s1964_s4, %s1964_s4, %s1962_s26  }
  0x22   : > { %s173_s6 = sand.u32 (!%p2022_p5), 1, %s1951_s13  }
  0x23   : > { %s1432_s7 = sshll.u32 (!%p2022_p5), %s173_s6, 10  ;;  %s174_s8 = scalar_lea.sflag (!%p2022_p5), [#allocation3], %s173_s6 }
  0x24   : > { %s2068_s9 = scalar_lea.vmem (!%p2022_p5), [#allocation2], %s1432_s7 }
  0x25   : > { %1938 = dma.done.wait (%p2015_p4), %s174_s8, 16384  }
  0x26   : > { %1940 = vsyncadd (%p2015_p4), %s174_s8, 4294950912 }
  0x27   : > { %1942 = dma.done.wait (%p2007_p1), [#allocation5], 8192  }
  0x28   : > { %1944 = vsyncadd (%p2007_p1), [#allocation5], 4294959104  ;;  %v1703_v0 = vld [vmem:[#allocation4 + $0x38] sm:$0xff]  ;;  %v1702_v4 = vld [vmem:[#allocation4 + $0x30] sm:$0xff]  ;;  %s1434_s22 = sshll.u32 %s1422_s16, 4 }
  0x29   : > { %v1711_v1 = vld [vmem:[#allocation4 + $0x78] sm:$0xff]  ;;  %921 = vmatpush.bf16.msra.mxu0 %v1703_v0  ;;  %v1710_v5 = vld [vmem:[#allocation4 + $0x70] sm:$0xff]  ;;  %v1701_v8 = vld [vmem:[#allocation4 + $0x28] sm:$0xff]  ;;  %p208_p1 = scmp.lt.s32.totalorder %s1434_s22, 31 }
  0x2a   : > { %v1719_v2 = vld [vmem:[#allocation4 + $0xb8] sm:$0xff]  ;;  %970 = vmatpush.bf16.msra.mxu1 %v1711_v1  ;;  %v1718_v6 = vld [vmem:[#allocation4 + $0xb0] sm:$0xff]  ;;  %v1709_v9 = vld [vmem:[#allocation4 + $0x68] sm:$0xff] }
  0x2b   : > { %v1727_v3 = vld [vmem:[#allocation4 + $0xf8] sm:$0xff]  ;;  %1019 = vmatpush.bf16.msra.mxu2 %v1719_v2  ;;  %v1726_v7 = vld [vmem:[#allocation4 + $0xf0] sm:$0xff]  ;;  %v1717_v10 = vld [vmem:[#allocation4 + $0xa8] sm:$0xff]  ;;  %s2316_s22 = smov (!%p208_p1, %s1434_s22), 31 }
  0x2c   : > { %1068 = vmatpush.bf16.msra.mxu3 %v1727_v3  ;;  %v1725_v11 = vld [vmem:[#allocation4 + $0xe8] sm:$0xff]  ;;  %v1700_v12 = vld [vmem:[#allocation4 + $0x20] sm:$0xff]  ;;  %v1699_v16 = vld [vmem:[#allocation4 + $0x18] sm:$0xff]  ;;  %s1435_s26 = sshll.u32 %s2316_s22, 2 }
  0x2d   : > { %922 = vmatpush.bf16.msra.mxu0 %v1702_v4  ;;  %v1708_v13 = vld [vmem:[#allocation4 + $0x60] sm:$0xff]  ;;  %v1707_v17 = vld [vmem:[#allocation4 + $0x58] sm:$0xff]  ;;  %v1698_v20 = vld [vmem:[#allocation4 + $0x10] sm:$0xff]  ;;  %s2266_s10 = scalar_lea.vmem %s2306_s3, %s1435_s26 }
  0x2e   : > { %971 = vmatpush.bf16.msra.mxu1 %v1710_v5  ;;  %v1716_v14 = vld [vmem:[#allocation4 + $0xa0] sm:$0xff]  ;;  %v1715_v18 = vld [vmem:[#allocation4 + $0x98] sm:$0xff]  ;;  %v1706_v21 = vld [vmem:[#allocation4 + $0x50] sm:$0xff] }
  0x2f   : > { %1020 = vmatpush.bf16.msra.mxu2 %v1718_v6  ;;  %v1724_v15 = vld [vmem:[#allocation4 + $0xe0] sm:$0xff]  ;;  %v1723_v19 = vld [vmem:[#allocation4 + $0xd8] sm:$0xff]  ;;  %v1714_v22 = vld [vmem:[#allocation4 + $0x90] sm:$0xff] }
  0x30   : > { %1069 = vmatpush.bf16.msra.mxu3 %v1726_v7  ;;  %v1722_v23 = vld [vmem:[#allocation4 + $0xd0] sm:$0xff]  ;;  %v1697_v24 = vld [vmem:[#allocation4 + $0x8] sm:$0xff]  ;;  %v1696_v28 = vld [vmem:[#allocation4] sm:$0xff] }
  0x31   : > { %923 = vmatpush.bf16.msra.mxu0 %v1701_v8  ;;  %v1705_v25 = vld [vmem:[#allocation4 + $0x48] sm:$0xff]  ;;  %v1704_v29 = vld [vmem:[#allocation4 + $0x40] sm:$0xff]  ;;  %v215_v36 = vld [vmem:[%s2068_s9 + $0x10] sm:$0xff] }
  0x32   : > { %972 = vmatpush.bf16.msra.mxu1 %v1709_v9  ;;  %v1713_v26 = vld [vmem:[#allocation4 + $0x88] sm:$0xff]  ;;  %v1712_v30 = vld [vmem:[#allocation4 + $0x80] sm:$0xff]  ;;  %v223_v37 = vld [vmem:[%s2068_s9 + $0x50] sm:$0xff] }
  0x33   : > { %1021 = vmatpush.bf16.msra.mxu2 %v1717_v10  ;;  %v1721_v27 = vld [vmem:[#allocation4 + $0xc8] sm:$0xff]  ;;  %v1720_v31 = vld [vmem:[#allocation4 + $0xc0] sm:$0xff]  ;;  %v216_v38 = vld [vmem:[%s2068_s9 + $0x18] sm:$0xff]  ;;  %v343_v44 = vpack.c.bf16 %v223_v37, %v215_v36 }
  0x34   : > { %1070 = vmatpush.bf16.msra.mxu3 %v1725_v11  ;;  %v213_v32 = vld [vmem:[%s2068_s9] sm:$0xff]  ;;  %v214_v34 = vld [vmem:[%s2068_s9 + $0x8] sm:$0xff]  ;;  %v224_v39 = vld [vmem:[%s2068_s9 + $0x58] sm:$0xff] }
  0x35   : > { %924 = vmatpush.bf16.msra.mxu0 %v1700_v12  ;;  %v221_v33 = vld [vmem:[%s2068_s9 + $0x40] sm:$0xff]  ;;  %v222_v35 = vld [vmem:[%s2068_s9 + $0x48] sm:$0xff]  ;;  %v1751_v40 = vld [vmem:[#allocation4 + $0x1b8] sm:$0xff]  ;;  %v344_v45 = vpack.c.bf16 %v224_v39, %v216_v38 }
  0x36   : > { %973 = vmatpush.bf16.msra.mxu1 %v1708_v13  ;;  %v1735_v41 = vld [vmem:[#allocation4 + $0x138] sm:$0xff]  ;;  %v341_v42 = vpack.c.bf16 %v221_v33, %v213_v32  ;;  %v342_v43 = vpack.c.bf16 %v222_v35, %v214_v34  ;;  %v1750_v48 = vld [vmem:[#allocation4 + $0x1b0] sm:$0xff]  ;;  %v1749_v52 = vld [vmem:[#allocation4 + $0x1a8] sm:$0xff] }
  0x37   : > { %1022 = vmatpush.bf16.msra.mxu2 %v1716_v14  ;;  %v1759_v46 = vld [vmem:[#allocation4 + $0x1f8] sm:$0xff]  ;;  %v1734_v49 = vld [vmem:[#allocation4 + $0x130] sm:$0xff]  ;;  %v1733_v53 = vld [vmem:[#allocation4 + $0x128] sm:$0xff] }
  0x38   : > { %1071 = vmatpush.bf16.msra.mxu3 %v1724_v15  ;;  %v1743_v47 = vld [vmem:[#allocation4 + $0x178] sm:$0xff]  ;;  %v1758_v50 = vld [vmem:[#allocation4 + $0x1f0] sm:$0xff]  ;;  %v1757_v54 = vld [vmem:[#allocation4 + $0x1e8] sm:$0xff] }
  0x39   : > { %925 = vmatpush.bf16.msra.mxu0 %v1699_v16  ;;  %v1742_v51 = vld [vmem:[#allocation4 + $0x170] sm:$0xff]  ;;  %v1741_v55 = vld [vmem:[#allocation4 + $0x168] sm:$0xff]  ;;  %v229_v56 = vld [vmem:[%s2068_s9 + $0x80] sm:$0xff] }
  0x3a   : > { %974 = vmatpush.bf16.msra.mxu1 %v1707_v17  ;;  %v237_v57 = vld [vmem:[%s2068_s9 + $0xc0] sm:$0xff]  ;;  %v230_v58 = vld [vmem:[%s2068_s9 + $0x88] sm:$0xff]  ;;  %v231_v60 = vld [vmem:[%s2068_s9 + $0x90] sm:$0xff] }
  0x3b   : > { %1023 = vmatpush.bf16.msra.mxu2 %v1715_v18  ;;  %v238_v59 = vld [vmem:[%s2068_s9 + $0xc8] sm:$0xff]  ;;  %v239_v61 = vld [vmem:[%s2068_s9 + $0xd0] sm:$0xff]  ;;  %v232_v62 = vld [vmem:[%s2068_s9 + $0x98] sm:$0xff]  ;;  %v349_v0 = vpack.c.bf16 %v237_v57, %v229_v56 }
  0x3c   : > { %1072 = vmatpush.bf16.msra.mxu3 %v1723_v19  ;;  %v240_v63 = vld [vmem:[%s2068_s9 + $0xd8] sm:$0xff]  ;;  %v350_v1 = vpack.c.bf16 %v238_v59, %v230_v58  ;;  %v351_v2 = vpack.c.bf16 %v239_v61, %v231_v60  ;;  %v1748_v4 = vld [vmem:[#allocation4 + $0x1a0] sm:$0xff]  ;;  %v246_v10 = vld [vmem:[%s2068_s9 + $0x108] sm:$0xff] }
  0x3d   : > { %926 = vmatpush.bf16.msra.mxu0 %v1698_v20  ;;  %v352_v3 = vpack.c.bf16 %v240_v63, %v232_v62  ;;  %v1732_v5 = vld [vmem:[#allocation4 + $0x120] sm:$0xff]  ;;  %v254_v11 = vld [vmem:[%s2068_s9 + $0x148] sm:$0xff]  ;;  %v247_v12 = vld [vmem:[%s2068_s9 + $0x110] sm:$0xff] }
  0x3e   : > { %975 = vmatpush.bf16.msra.mxu1 %v1706_v21  ;;  %v1756_v6 = vld [vmem:[#allocation4 + $0x1e0] sm:$0xff]  ;;  %v255_v13 = vld [vmem:[%s2068_s9 + $0x150] sm:$0xff]  ;;  %v248_v14 = vld [vmem:[%s2068_s9 + $0x118] sm:$0xff]  ;;  %v358_v17 = vpack.c.bf16 %v254_v11, %v246_v10 }
  0x3f   : > { %1024 = vmatpush.bf16.msra.mxu2 %v1714_v22  ;;  %v1740_v7 = vld [vmem:[#allocation4 + $0x160] sm:$0xff]  ;;  %v256_v15 = vld [vmem:[%s2068_s9 + $0x158] sm:$0xff]  ;;  %v359_v18 = vpack.c.bf16 %v255_v13, %v247_v12  ;;  %v1746_v36 = vld [vmem:[#allocation4 + $0x190] sm:$0xff] }
  0x40   : > { %1073 = vmatpush.bf16.msra.mxu3 %v1722_v23  ;;  %v245_v8 = vld [vmem:[%s2068_s9 + $0x100] sm:$0xff]  ;;  %v360_v19 = vpack.c.bf16 %v256_v15, %v248_v14  ;;  %v1747_v20 = vld [vmem:[#allocation4 + $0x198] sm:$0xff]  ;;  %v1730_v37 = vld [vmem:[#allocation4 + $0x110] sm:$0xff] }
  0x41   : > { %927 = vmatpush.bf16.msra.mxu0 %v1697_v24  ;;  %v253_v9 = vld [vmem:[%s2068_s9 + $0x140] sm:$0xff]  ;;  %v1731_v21 = vld [vmem:[#allocation4 + $0x118] sm:$0xff]  ;;  %v1754_v38 = vld [vmem:[#allocation4 + $0x1d0] sm:$0xff] }
  0x42   : > { %976 = vmatpush.bf16.msra.mxu1 %v1705_v25  ;;  %v357_v16 = vpack.c.bf16 %v253_v9, %v245_v8  ;;  %v1755_v22 = vld [vmem:[#allocation4 + $0x1d8] sm:$0xff]  ;;  %v261_v24 = vld [vmem:[%s2068_s9 + $0x180] sm:$0xff]  ;;  %v1738_v39 = vld [vmem:[#allocation4 + $0x150] sm:$0xff] }
  0x43   : > { %1025 = vmatpush.bf16.msra.mxu2 %v1713_v26  ;;  %v1739_v23 = vld [vmem:[#allocation4 + $0x158] sm:$0xff]  ;;  %v269_v25 = vld [vmem:[%s2068_s9 + $0x1c0] sm:$0xff]  ;;  %v262_v26 = vld [vmem:[%s2068_s9 + $0x188] sm:$0xff] }
  0x44   : > { %1074 = vmatpush.bf16.msra.mxu3 %v1721_v27  ;;  %v270_v27 = vld [vmem:[%s2068_s9 + $0x1c8] sm:$0xff]  ;;  %v365_v32 = vpack.c.bf16 %v269_v25, %v261_v24  ;;  %v293_v56 = vld [vmem:[%s2068_s9 + $0x280] sm:$0xff]  ;;  %v295_v60 = vld [vmem:[%s2068_s9 + $0x290] sm:$0xff] }
  0x45   : > { %928 = vmatpush.bf16.msra.mxu0 %v1696_v28  ;;  %v263_v28 = vld [vmem:[%s2068_s9 + $0x190] sm:$0xff]  ;;  %v366_v33 = vpack.c.bf16 %v270_v27, %v262_v26  ;;  %v301_v57 = vld [vmem:[%s2068_s9 + $0x2c0] sm:$0xff]  ;;  %v294_v58 = vld [vmem:[%s2068_s9 + $0x288] sm:$0xff] }
  0x46   : > { %977 = vmatpush.bf16.msra.mxu1 %v1704_v29  ;;  %v271_v29 = vld [vmem:[%s2068_s9 + $0x1d0] sm:$0xff]  ;;  %v302_v59 = vld [vmem:[%s2068_s9 + $0x2c8] sm:$0xff]  ;;  %v296_v62 = vld [vmem:[%s2068_s9 + $0x298] sm:$0xff] }
  0x47   : > { %1026 = vmatpush.bf16.msra.mxu2 %v1712_v30  ;;  %v264_v30 = vld [vmem:[%s2068_s9 + $0x198] sm:$0xff]  ;;  %v367_v34 = vpack.c.bf16 %v271_v29, %v263_v28  ;;  %v303_v61 = vld [vmem:[%s2068_s9 + $0x2d0] sm:$0xff]  ;;  %v309_v8 = vld [vmem:[%s2068_s9 + $0x300] sm:$0xff] }
  0x48   : > { %1075 = vmatpush.bf16.msra.mxu3 %v1720_v31  ;;  %929 = vmatmul.bf16.vlgmr.msra.gmra.mxu0 %v341_v42  ;;  %v272_v31 = vld [vmem:[%s2068_s9 + $0x1d8] sm:$0xff]  ;;  %v278_v42 = vld [vmem:[%s2068_s9 + $0x208] sm:$0xff]  ;;  %v317_v9 = vld [vmem:[%s2068_s9 + $0x340] sm:$0xff] }
  0x49   : > { %1117 = vmatpush.bf16.msrb.mxu0 %v1735_v41  ;;  %978 = vmatmul.bf16.vlgmr.msra.gmra.mxu1 %v342_v43  ;;  %v368_v35 = vpack.c.bf16 %v272_v31, %v264_v30  ;;  %v285_v41 = vld [vmem:[%s2068_s9 + $0x240] sm:$0xff]  ;;  %v286_v43 = vld [vmem:[%s2068_s9 + $0x248] sm:$0xff]  ;;  %v304_v63 = vld [vmem:[%s2068_s9 + $0x2d8] sm:$0xff] }
  0x4a   : > { %1027 = vmatmul.bf16.vlgmr.msra.gmra.mxu2 %v343_v44  ;;  %1166 = vmatpush.bf16.msrb.mxu1 %v1743_v47  ;;  %v279_v44 = vld [vmem:[%s2068_s9 + $0x210] sm:$0xff]  ;;  %v288_v47 = vld [vmem:[%s2068_s9 + $0x258] sm:$0xff]  ;;  %v310_v10 = vld [vmem:[%s2068_s9 + $0x308] sm:$0xff] }
  0x4b   : > { %1215 = vmatpush.bf16.msrb.mxu2 %v1751_v40  ;;  %1076 = vmatmul.bf16.vlgmr.msra.gmra.mxu3 %v344_v45  ;;  %v277_v40 = vld [vmem:[%s2068_s9 + $0x200] sm:$0xff]  ;;  %v287_v45 = vld [vmem:[%s2068_s9 + $0x250] sm:$0xff]  ;;  %v318_v11 = vld [vmem:[%s2068_s9 + $0x348] sm:$0xff] }
  0x4c   : > { %1264 = vmatpush.bf16.msrb.mxu3 %v1759_v46  ;;  %v280_v46 = vld [vmem:[%s2068_s9 + $0x218] sm:$0xff]  ;;  %v311_v12 = vld [vmem:[%s2068_s9 + $0x310] sm:$0xff] }
  0x4d   : > { %1118 = vmatpush.bf16.msrb.mxu0 %v1734_v49  ;;  %v374_v49 = vpack.c.bf16 %v286_v43, %v278_v42  ;;  %v319_v13 = vld [vmem:[%s2068_s9 + $0x350] sm:$0xff]  ;;  %v312_v14 = vld [vmem:[%s2068_s9 + $0x318] sm:$0xff] }
  0x4e   : > { %1167 = vmatpush.bf16.msrb.mxu1 %v1742_v51  ;;  %v376_v51 = vpack.c.bf16 %v288_v47, %v280_v46  ;;  %v320_v15 = vld [vmem:[%s2068_s9 + $0x358] sm:$0xff]  ;;  %v327_v24 = vld [vmem:[%s2068_s9 + $0x390] sm:$0xff] }
  0x4f   : > { %1216 = vmatpush.bf16.msrb.mxu2 %v1750_v48  ;;  %v373_v48 = vpack.c.bf16 %v285_v41, %v277_v40  ;;  %v335_v25 = vld [vmem:[%s2068_s9 + $0x3d0] sm:$0xff]  ;;  %v328_v26 = vld [vmem:[%s2068_s9 + $0x398] sm:$0xff] }
  0x50   : > { %1265 = vmatpush.bf16.msrb.mxu3 %v1758_v50  ;;  %v375_v50 = vpack.c.bf16 %v287_v45, %v279_v44  ;;  %v336_v27 = vld [vmem:[%s2068_s9 + $0x3d8] sm:$0xff]  ;;  %v399_v30 = vpack.c.bf16 %v335_v25, %v327_v24  ;;  %v258_v24 = vld [vmem:[%s2068_s9 + $0x168] sm:$0xff]  ;;  %v251_v25 = vld [vmem:[%s2068_s9 + $0x130] sm:$0xff] }
  0x51   : > { %1119 = vmatpush.bf16.msrb.mxu0 %v1733_v53  ;;  %v1729_v53 = vld [vmem:[#allocation4 + $0x108] sm:$0xff]  ;;  %v400_v31 = vpack.c.bf16 %v336_v27, %v328_v26  ;;  %v228_v40 = vld [vmem:[%s2068_s9 + $0x78] sm:$0xff]  ;;  %v259_v26 = vld [vmem:[%s2068_s9 + $0x170] sm:$0xff] }
  0x52   : > { %1168 = vmatpush.bf16.msrb.mxu1 %v1741_v55  ;;  %v1737_v55 = vld [vmem:[#allocation4 + $0x148] sm:$0xff]  ;;  %v252_v27 = vld [vmem:[%s2068_s9 + $0x138] sm:$0xff] }
  0x53   : > { %1217 = vmatpush.bf16.msrb.mxu2 %v1749_v52  ;;  %v1745_v52 = vld [vmem:[#allocation4 + $0x188] sm:$0xff] }
  0x54   : > { %1266 = vmatpush.bf16.msrb.mxu3 %v1757_v54  ;;  %v1753_v54 = vld [vmem:[#allocation4 + $0x1c8] sm:$0xff] }
  0x55   : > { %1120 = vmatpush.bf16.msrb.mxu0 %v1732_v5  ;;  %v1728_v5 = vld [vmem:[#allocation4 + $0x100] sm:$0xff] }
  0x56   : > { %1169 = vmatpush.bf16.msrb.mxu1 %v1740_v7  ;;  %v1736_v7 = vld [vmem:[#allocation4 + $0x140] sm:$0xff] }
  0x57   : > { %1218 = vmatpush.bf16.msrb.mxu2 %v1748_v4  ;;  %v1744_v4 = vld [vmem:[#allocation4 + $0x180] sm:$0xff] }
  0x58   : > { %934 = vmatmul.bf16.gmra.mxu0 %v349_v0  ;;  %1267 = vmatpush.bf16.msrb.mxu3 %v1756_v6  ;;  %v381_v0 = vpack.c.bf16 %v301_v57, %v293_v56  ;;  %v1752_v6 = vld [vmem:[#allocation4 + $0x1c0] sm:$0xff] }
  0x59   : > { %983 = vmatmul.bf16.gmra.mxu1 %v350_v1  ;;  %1121 = vmatpush.bf16.msrb.mxu0 %v1731_v21  ;;  %v382_v1 = vpack.c.bf16 %v302_v59, %v294_v58  ;;  %v333_v21 = vld [vmem:[%s2068_s9 + $0x3c0] sm:$0xff]  ;;  %v234_v59 = vld [vmem:[%s2068_s9 + $0xa8] sm:$0xff] }
  0x5a   : > { %1032 = vmatmul.bf16.gmra.mxu2 %v351_v2  ;;  %1170 = vmatpush.bf16.msrb.mxu1 %v1739_v23  ;;  %v383_v2 = vpack.c.bf16 %v303_v61, %v295_v60  ;;  %v334_v23 = vld [vmem:[%s2068_s9 + $0x3c8] sm:$0xff]  ;;  %v233_v57 = vld [vmem:[%s2068_s9 + $0xa0] sm:$0xff]  ;;  %v235_v61 = vld [vmem:[%s2068_s9 + $0xb0] sm:$0xff] }
  0x5b   : > { %1081 = vmatmul.bf16.gmra.mxu3 %v352_v3  ;;  %1219 = vmatpush.bf16.msrb.mxu2 %v1747_v20  ;;  %v384_v3 = vpack.c.bf16 %v304_v63, %v296_v62  ;;  %v325_v20 = vld [vmem:[%s2068_s9 + $0x380] sm:$0xff]  ;;  %v242_v60 = vld [vmem:[%s2068_s9 + $0xe8] sm:$0xff]  ;;  %v243_v62 = vld [vmem:[%s2068_s9 + $0xf0] sm:$0xff] }
  0x5c   : > { %1268 = vmatpush.bf16.msrb.mxu3 %v1755_v22  ;;  %v326_v22 = vld [vmem:[%s2068_s9 + $0x388] sm:$0xff]  ;;  %v397_v28 = vpack.c.bf16 %v333_v21, %v325_v20  ;;  %v241_v58 = vld [vmem:[%s2068_s9 + $0xe0] sm:$0xff]  ;;  %v236_v63 = vld [vmem:[%s2068_s9 + $0xb8] sm:$0xff] }
  0x5d   : > { %1122 = vmatpush.bf16.msrb.mxu0 %v1730_v37  ;;  %v398_v29 = vpack.c.bf16 %v334_v23, %v326_v22  ;;  %v219_v37 = vld [vmem:[%s2068_s9 + $0x30] sm:$0xff]  ;;  %v249_v21 = vld [vmem:[%s2068_s9 + $0x120] sm:$0xff]  ;;  %v250_v23 = vld [vmem:[%s2068_s9 + $0x128] sm:$0xff] }
  0x5e   : > { %1171 = vmatpush.bf16.msrb.mxu1 %v1738_v39  ;;  %v220_v39 = vld [vmem:[%s2068_s9 + $0x38] sm:$0xff]  ;;  %v257_v22 = vld [vmem:[%s2068_s9 + $0x160] sm:$0xff] }
  0x5f   : > { %1220 = vmatpush.bf16.msrb.mxu2 %v1746_v36  ;;  %v226_v36 = vld [vmem:[%s2068_s9 + $0x68] sm:$0xff]  ;;  %v348_v46 = vpack.c.bf16 %v228_v40, %v220_v39 }
  0x60   : > { %1269 = vmatpush.bf16.msrb.mxu3 %v1754_v38  ;;  %v227_v38 = vld [vmem:[%s2068_s9 + $0x70] sm:$0xff] }
  0x61   : > { %1123 = vmatpush.bf16.msrb.mxu0 %v1729_v53  ;;  %v347_v45 = vpack.c.bf16 %v227_v38, %v219_v37  ;;  %v363_v37 = vpack.c.bf16 %v259_v26, %v251_v25 }
  0x62   : > { %1172 = vmatpush.bf16.msrb.mxu1 %v1737_v55 }
  0x63   : > { %1221 = vmatpush.bf16.msrb.mxu2 %v1745_v52 }
  0x64   : > { %1270 = vmatpush.bf16.msrb.mxu3 %v1753_v54 }
  0x65   : > { %1124 = vmatpush.bf16.msrb.mxu0 %v1728_v5 }
  0x66   : > { %1173 = vmatpush.bf16.msrb.mxu1 %v1736_v7 }
  0x67   : > { %1222 = vmatpush.bf16.msrb.mxu2 %v1744_v4  ;;  %v354_v4 = vpack.c.bf16 %v242_v60, %v234_v59 }
  0x68   : > { %939 = vmatmul.bf16.gmra.mxu0 %v357_v16  ;;  %1271 = vmatpush.bf16.msrb.mxu3 %v1752_v6  ;;  %v389_v16 = vpack.c.bf16 %v317_v9, %v309_v8  ;;  %v355_v8 = vpack.c.bf16 %v243_v62, %v235_v61 }
  0x69   : > { %988 = vmatmul.bf16.gmra.mxu1 %v358_v17  ;;  %v390_v17 = vpack.c.bf16 %v318_v11, %v310_v10 }
  0x6a   : > { %1037 = vmatmul.bf16.gmra.mxu2 %v359_v18  ;;  %v391_v18 = vpack.c.bf16 %v319_v13, %v311_v12 }
  0x6b   : > { %1086 = vmatmul.bf16.gmra.mxu3 %v360_v19  ;;  %v392_v19 = vpack.c.bf16 %v320_v15, %v312_v14 }
  0x78   : > { %944 = vmatmul.bf16.gmra.mxu0 %v365_v32  ;;  %v2145_v32 = vld [vmem:[%s2305_s2] ss:$0 sm:$0xff] }
  0x79   : > { %993 = vmatmul.bf16.gmra.mxu1 %v366_v33  ;;  %v217_v33 = vld [vmem:[%s2068_s9 + $0x20] sm:$0xff] }
  0x7a   : > { %1042 = vmatmul.bf16.gmra.mxu2 %v367_v34  ;;  %v225_v34 = vld [vmem:[%s2068_s9 + $0x60] sm:$0xff] }
  0x7b   : > { %1091 = vmatmul.bf16.gmra.mxu3 %v368_v35  ;;  %v218_v35 = vld [vmem:[%s2068_s9 + $0x28] sm:$0xff]  ;;  %v345_v41 = vpack.c.bf16 %v225_v34, %v217_v33  ;;  %v362_v33 = vpack.c.bf16 %v258_v24, %v250_v23  ;;  %v284_v23 = vld [vmem:[%s2068_s9 + $0x238] sm:$0xff] }
  0x7c   : > { %v346_v42 = vpack.c.bf16 %v226_v36, %v218_v35  ;;  %v292_v24 = vld [vmem:[%s2068_s9 + $0x278] sm:$0xff] }
  0x88   : > { %949 = vmatmul.bf16.gmra.mxu0 %v373_v48 }
  0x89   : > { %998 = vmatmul.bf16.gmra.mxu1 %v374_v49 }
  0x8a   : > { %1047 = vmatmul.bf16.gmra.mxu2 %v375_v50 }
  0x8b   : > { %1096 = vmatmul.bf16.gmra.mxu3 %v376_v51 }
  0x98   : > { %954 = vmatmul.bf16.gmra.mxu0 %v381_v0  ;;  %v244_v0 = vld [vmem:[%s2068_s9 + $0xf8] sm:$0xff] }
  0x99   : > { %1003 = vmatmul.bf16.gmra.mxu1 %v382_v1  ;;  %v356_v9 = vpack.c.bf16 %v244_v0, %v236_v63 }
  0x9a   : > { %1052 = vmatmul.bf16.gmra.mxu2 %v383_v2 }
  0x9b   : > { %1101 = vmatmul.bf16.gmra.mxu3 %v384_v3  ;;  %v353_v3 = vpack.c.bf16 %v241_v58, %v233_v57  ;;  %v268_v57 = vld [vmem:[%s2068_s9 + $0x1b8] sm:$0xff] }
  0x9c   : > { %v276_v58 = vld [vmem:[%s2068_s9 + $0x1f8] sm:$0xff] }
  0xa8   : > { %959 = vmatmul.bf16.gmra.mxu0 %v389_v16 }
  0xa9   : > { %1008 = vmatmul.bf16.gmra.mxu1 %v390_v17 }
  0xaa   : > { %1057 = vmatmul.bf16.gmra.mxu2 %v391_v18 }
  0xab   : > { %1106 = vmatmul.bf16.gmra.mxu3 %v392_v19 }
  0xb8   : > { %964 = vmatmul.bf16.gmra.mxu0 %v397_v28  ;;  %v260_v28 = vld [vmem:[%s2068_s9 + $0x178] sm:$0xff] }
  0xb9   : > { %1013 = vmatmul.bf16.gmra.mxu1 %v398_v29  ;;  %v364_v38 = vpack.c.bf16 %v260_v28, %v252_v27 }
  0xba   : > { %1062 = vmatmul.bf16.gmra.mxu2 %v399_v30 }
  0xbb   : > { %1111 = vmatmul.bf16.gmra.mxu3 %v400_v31  ;;  %v361_v31 = vpack.c.bf16 %v257_v22, %v249_v21  ;;  %v283_v21 = vld [vmem:[%s2068_s9 + $0x230] sm:$0xff] }
  0xbc   : > { %v291_v22 = vld [vmem:[%s2068_s9 + $0x270] sm:$0xff] }
  0xc5   : > { %v930_v43 = vpop.f32.mrf.mxu0 }
  0xc6   : > { %v979_v44 = vpop.f32.mrf.mxu1  ;;  %v931_v47 = vadd.f32 %v2145_v32, %v930_v43 }
  0xc8   : > { %v980_v48 = vadd.f32 %v979_v44, %v931_v47  ;;  %1125 = vmatmul.bf16.vlgmr.msrb.gmra.mxu0 %v345_v41 }
  0xc9   : > { %1174 = vmatmul.bf16.vlgmr.msrb.gmra.mxu1 %v346_v42 }
  0xca   : > { %1223 = vmatmul.bf16.vlgmr.msrb.gmra.mxu2 %v347_v45 }
  0xcb   : > { %1272 = vmatmul.bf16.vlgmr.msrb.gmra.mxu3 %v348_v46 }
  0xcd   : > { %v1028_v49 = vpop.f32.mrf.mxu2  ;;  %v932_v52 = vpop.f32.mrf.mxu0 }
  0xce   : > { %v1077_v50 = vpop.f32.mrf.mxu3  ;;  %v1029_v51 = vadd.f32 %v1028_v49, %v980_v48  ;;  %v981_v53 = vpop.f32.mrf.mxu1  ;;  %v933_v54 = vadd.f32 %v2145_v32, %v932_v52  ;;  %v266_v52 = vld [vmem:[%s2068_s9 + $0x1a8] sm:$0xff] }
  0xd0   : > { %v2157_v55 = vadd.f32 %v1077_v50, %v1029_v51  ;;  %v982_v56 = vadd.f32 %v981_v53, %v933_v54  ;;  %v265_v50 = vld [vmem:[%s2068_s9 + $0x1a0] sm:$0xff]  ;;  %v274_v53 = vld [vmem:[%s2068_s9 + $0x1e8] sm:$0xff]  ;;  %v267_v54 = vld [vmem:[%s2068_s9 + $0x1b0] sm:$0xff] }
  0xd1   : > { %v273_v51 = vld [vmem:[%s2068_s9 + $0x1e0] sm:$0xff]  ;;  %v370_v62 = vpack.c.bf16 %v274_v53, %v266_v52  ;;  %v299_v52 = vld [vmem:[%s2068_s9 + $0x2b0] sm:$0xff] }
  0xd2   : > { %v369_v61 = vpack.c.bf16 %v273_v51, %v265_v50  ;;  %v298_v50 = vld [vmem:[%s2068_s9 + $0x2a8] sm:$0xff]  ;;  %v307_v53 = vld [vmem:[%s2068_s9 + $0x2f0] sm:$0xff] }
  0xd3   : > { %v306_v51 = vld [vmem:[%s2068_s9 + $0x2e8] sm:$0xff] }
  0xd5   : > { %v1030_v1 = vpop.f32.mrf.mxu2  ;;  %v935_v6 = vpop.f32.mrf.mxu0 }
  0xd6   : > { %v1079_v2 = vpop.f32.mrf.mxu3  ;;  %v1031_v5 = vadd.f32 %v1030_v1, %v982_v56  ;;  %v984_v7 = vpop.f32.mrf.mxu1  ;;  %v936_v10 = vadd.f32 %v2145_v32, %v935_v6  ;;  %v275_v56 = vld [vmem:[%s2068_s9 + $0x1f0] sm:$0xff] }
  0xd8   : > { %v2168_v11 = vadd.f32 %v1079_v2, %v1031_v5  ;;  %v985_v12 = vadd.f32 %v984_v7, %v936_v10  ;;  %1130 = vmatmul.bf16.gmra.mxu0 %v353_v3  ;;  %v371_v2 = vpack.c.bf16 %v275_v56, %v267_v54  ;;  %v372_v3 = vpack.c.bf16 %v276_v58, %v268_v57  ;;  %v300_v54 = vld [vmem:[%s2068_s9 + $0x2b8] sm:$0xff] }
  0xd9   : > { %1179 = vmatmul.bf16.gmra.mxu1 %v354_v4  ;;  %v308_v56 = vld [vmem:[%s2068_s9 + $0x2f8] sm:$0xff] }
  0xda   : > { %1228 = vmatmul.bf16.gmra.mxu2 %v355_v8 }
  0xdb   : > { %1277 = vmatmul.bf16.gmra.mxu3 %v356_v9 }
  0xdd   : > { %v1033_v13 = vpop.f32.mrf.mxu2  ;;  %v937_v16 = vpop.f32.mrf.mxu0 }
  0xde   : > { %v1082_v14 = vpop.f32.mrf.mxu3  ;;  %v1034_v15 = vadd.f32 %v1033_v13, %v985_v12  ;;  %v986_v17 = vpop.f32.mrf.mxu1  ;;  %v938_v18 = vadd.f32 %v2145_v32, %v937_v16  ;;  %v281_v16 = vld [vmem:[%s2068_s9 + $0x220] sm:$0xff] }
  0xe0   : > { %v2171_v19 = vadd.f32 %v1082_v14, %v1034_v15  ;;  %v987_v20 = vadd.f32 %v986_v17, %v938_v18  ;;  %v289_v17 = vld [vmem:[%s2068_s9 + $0x260] sm:$0xff]  ;;  %v282_v18 = vld [vmem:[%s2068_s9 + $0x228] sm:$0xff] }
  0xe1   : > { %v377_v27 = vpack.c.bf16 %v289_v17, %v281_v16  ;;  %v313_v16 = vld [vmem:[%s2068_s9 + $0x320] sm:$0xff] }
  0xe2   : > { %v321_v17 = vld [vmem:[%s2068_s9 + $0x360] sm:$0xff] }
  0xe5   : > { %v1035_v29 = vpop.f32.mrf.mxu2  ;;  %v940_v35 = vpop.f32.mrf.mxu0 }
  0xe6   : > { %v1084_v30 = vpop.f32.mrf.mxu3  ;;  %v1036_v34 = vadd.f32 %v1035_v29, %v987_v20  ;;  %v989_v36 = vpop.f32.mrf.mxu1  ;;  %v941_v39 = vadd.f32 %v2145_v32, %v940_v35  ;;  %v290_v20 = vld [vmem:[%s2068_s9 + $0x268] sm:$0xff] }
  0xe7   : > { %v378_v28 = vpack.c.bf16 %v290_v20, %v282_v18  ;;  %v314_v18 = vld [vmem:[%s2068_s9 + $0x328] sm:$0xff] }
  0xe8   : > { %v2182_v40 = vadd.f32 %v1084_v30, %v1036_v34  ;;  %v990_v41 = vadd.f32 %v989_v36, %v941_v39  ;;  %1135 = vmatmul.bf16.gmra.mxu0 %v361_v31  ;;  %v380_v34 = vpack.c.bf16 %v292_v24, %v284_v23  ;;  %v322_v20 = vld [vmem:[%s2068_s9 + $0x368] sm:$0xff]  ;;  %v316_v23 = vld [vmem:[%s2068_s9 + $0x338] sm:$0xff] }
  0xe9   : > { %1184 = vmatmul.bf16.gmra.mxu1 %v362_v33  ;;  %v379_v33 = vpack.c.bf16 %v291_v22, %v283_v21  ;;  %v315_v21 = vld [vmem:[%s2068_s9 + $0x330] sm:$0xff]  ;;  %v324_v24 = vld [vmem:[%s2068_s9 + $0x378] sm:$0xff] }
  0xea   : > { %1233 = vmatmul.bf16.gmra.mxu2 %v363_v37  ;;  %v323_v22 = vld [vmem:[%s2068_s9 + $0x370] sm:$0xff] }
  0xeb   : > { %1282 = vmatmul.bf16.gmra.mxu3 %v364_v38 }
  0xed   : > { %v1038_v42 = vpop.f32.mrf.mxu2  ;;  %v942_v45 = vpop.f32.mrf.mxu0 }
  0xee   : > { %v1087_v43 = vpop.f32.mrf.mxu3  ;;  %v1039_v44 = vadd.f32 %v1038_v42, %v990_v41  ;;  %v991_v46 = vpop.f32.mrf.mxu1  ;;  %v943_v47 = vadd.f32 %v2145_v32, %v942_v45 }
  0xf0   : > { %v2185_v48 = vadd.f32 %v1087_v43, %v1039_v44  ;;  %v992_v49 = vadd.f32 %v991_v46, %v943_v47  ;;  %v297_v47 = vld [vmem:[%s2068_s9 + $0x2a0] sm:$0xff] }
  0xf5   : > { %v1040_v59 = vpop.f32.mrf.mxu2  ;;  %v945_v0 = vpop.f32.mrf.mxu0 }
  0xf6   : > { %v1089_v60 = vpop.f32.mrf.mxu3  ;;  %v1041_v63 = vadd.f32 %v1040_v59, %v992_v49  ;;  %v994_v1 = vpop.f32.mrf.mxu1  ;;  %v946_v4 = vadd.f32 %v2145_v32, %v945_v0  ;;  %v305_v49 = vld [vmem:[%s2068_s9 + $0x2e0] sm:$0xff]  ;;  %v387_v0 = vpack.c.bf16 %v307_v53, %v299_v52  ;;  %v330_v52 = vld [vmem:[%s2068_s9 + $0x3a8] sm:$0xff] }
  0xf7   : > { %v385_v59 = vpack.c.bf16 %v305_v49, %v297_v47  ;;  %v338_v53 = vld [vmem:[%s2068_s9 + $0x3e8] sm:$0xff] }
  0xf8   : > { %v2196_v5 = vadd.f32 %v1089_v60, %v1041_v63  ;;  %v995_v6 = vadd.f32 %v994_v1, %v946_v4  ;;  %1140 = vmatmul.bf16.gmra.mxu0 %v369_v61  ;;  %v386_v60 = vpack.c.bf16 %v306_v51, %v298_v50  ;;  %v388_v1 = vpack.c.bf16 %v308_v56, %v300_v54  ;;  %v329_v50 = vld [vmem:[%s2068_s9 + $0x3a0] sm:$0xff]  ;;  %v331_v54 = vld [vmem:[%s2068_s9 + $0x3b0] sm:$0xff] }
  0xf9   : > { %1189 = vmatmul.bf16.gmra.mxu1 %v370_v62  ;;  %v337_v51 = vld [vmem:[%s2068_s9 + $0x3e0] sm:$0xff]  ;;  %v339_v56 = vld [vmem:[%s2068_s9 + $0x3f0] sm:$0xff] }
  0xfa   : > { %1238 = vmatmul.bf16.gmra.mxu2 %v371_v2 }
  0xfb   : > { %1287 = vmatmul.bf16.gmra.mxu3 %v372_v3 }
  0xfd   : > { %v1043_v7 = vpop.f32.mrf.mxu2  ;;  %v947_v10 = vpop.f32.mrf.mxu0 }
  0xfe   : > { %v1092_v8 = vpop.f32.mrf.mxu3  ;;  %v1044_v9 = vadd.f32 %v1043_v7, %v995_v6  ;;  %v996_v12 = vpop.f32.mrf.mxu1  ;;  %v948_v13 = vadd.f32 %v2145_v32, %v947_v10 }
 0x100   : > { %v2199_v14 = vadd.f32 %v1092_v8, %v1044_v9  ;;  %v997_v15 = vadd.f32 %v996_v12, %v948_v13 }
 0x105   : > { %v1045_v25 = vpop.f32.mrf.mxu2  ;;  %v950_v30 = vpop.f32.mrf.mxu0 }
 0x106   : > { %v1094_v26 = vpop.f32.mrf.mxu3  ;;  %v1046_v29 = vadd.f32 %v1045_v25, %v997_v15  ;;  %v999_v31 = vpop.f32.mrf.mxu1  ;;  %v951_v35 = vadd.f32 %v2145_v32, %v950_v30 }
 0x108   : > { %v2210_v36 = vadd.f32 %v1094_v26, %v1046_v29  ;;  %v1000_v37 = vadd.f32 %v999_v31, %v951_v35  ;;  %1145 = vmatmul.bf16.gmra.mxu0 %v377_v27  ;;  %v393_v27 = vpack.c.bf16 %v321_v17, %v313_v16 }
 0x109   : > { %1194 = vmatmul.bf16.gmra.mxu1 %v378_v28  ;;  %v394_v28 = vpack.c.bf16 %v322_v20, %v314_v18 }
 0x10a   : > { %1243 = vmatmul.bf16.gmra.mxu2 %v379_v33  ;;  %v395_v33 = vpack.c.bf16 %v323_v22, %v315_v21 }
 0x10b   : > { %1292 = vmatmul.bf16.gmra.mxu3 %v380_v34  ;;  %v396_v34 = vpack.c.bf16 %v324_v24, %v316_v23 }
 0x10d   : > { %v1048_v38 = vpop.f32.mrf.mxu2  ;;  %v952_v42 = vpop.f32.mrf.mxu0 }
 0x10e   : > { %v1097_v39 = vpop.f32.mrf.mxu3  ;;  %v1049_v41 = vadd.f32 %v1048_v38, %v1000_v37  ;;  %v1001_v43 = vpop.f32.mrf.mxu1  ;;  %v953_v44 = vadd.f32 %v2145_v32, %v952_v42 }
 0x110   : > { %v2213_v45 = vadd.f32 %v1097_v39, %v1049_v41  ;;  %v1002_v46 = vadd.f32 %v1001_v43, %v953_v44 }
 0x115   : > { %v1050_v57 = vpop.f32.mrf.mxu2  ;;  %v955_v62 = vpop.f32.mrf.mxu0 }
 0x116   : > { %v1099_v58 = vpop.f32.mrf.mxu3  ;;  %v1051_v61 = vadd.f32 %v1050_v57, %v1002_v46  ;;  %v1004_v63 = vpop.f32.mrf.mxu1  ;;  %v956_v2 = vadd.f32 %v2145_v32, %v955_v62  ;;  %v332_v57 = vld [vmem:[%s2068_s9 + $0x3b8] sm:$0xff]  ;;  %v402_v62 = vpack.c.bf16 %v338_v53, %v330_v52 }
 0x118   : > { %v2224_v3 = vadd.f32 %v1099_v58, %v1051_v61  ;;  %v1005_v4 = vadd.f32 %v1004_v63, %v956_v2  ;;  %1150 = vmatmul.bf16.gmra.mxu0 %v385_v59  ;;  %v340_v58 = vld [vmem:[%s2068_s9 + $0x3f8] sm:$0xff]  ;;  %v401_v61 = vpack.c.bf16 %v337_v51, %v329_v50  ;;  %v403_v2 = vpack.c.bf16 %v339_v56, %v331_v54 }
 0x119   : > { %1199 = vmatmul.bf16.gmra.mxu1 %v386_v60 }
 0x11a   : > { %1248 = vmatmul.bf16.gmra.mxu2 %v387_v0 }
 0x11b   : > { %1297 = vmatmul.bf16.gmra.mxu3 %v388_v1 }
 0x11d   : > { %v1053_v6 = vpop.f32.mrf.mxu2  ;;  %v957_v9 = vpop.f32.mrf.mxu0 }
 0x11e   : > { %v1102_v7 = vpop.f32.mrf.mxu3  ;;  %v1054_v8 = vadd.f32 %v1053_v6, %v1005_v4  ;;  %v1006_v10 = vpop.f32.mrf.mxu1  ;;  %v958_v12 = vadd.f32 %v2145_v32, %v957_v9  ;;  %v404_v4 = vpack.c.bf16 %v340_v58, %v332_v57 }
 0x120   : > { %v2227_v13 = vadd.f32 %v1102_v7, %v1054_v8  ;;  %v1007_v15 = vadd.f32 %v1006_v10, %v958_v12 }
 0x125   : > { %v1055_v25 = vpop.f32.mrf.mxu2  ;;  %v960_v30 = vpop.f32.mrf.mxu0 }
 0x126   : > { %v1104_v26 = vpop.f32.mrf.mxu3  ;;  %v1056_v29 = vadd.f32 %v1055_v25, %v1007_v15  ;;  %v1009_v31 = vpop.f32.mrf.mxu1  ;;  %v961_v35 = vadd.f32 %v2145_v32, %v960_v30 }
 0x128   : > { %v2238_v37 = vadd.f32 %v1104_v26, %v1056_v29  ;;  %v1010_v38 = vadd.f32 %v1009_v31, %v961_v35  ;;  %1155 = vmatmul.bf16.gmra.mxu0 %v393_v27 }
 0x129   : > { %1204 = vmatmul.bf16.gmra.mxu1 %v394_v28 }
 0x12a   : > { %1253 = vmatmul.bf16.gmra.mxu2 %v395_v33 }
 0x12b   : > { %1302 = vmatmul.bf16.gmra.mxu3 %v396_v34 }
 0x12d   : > { %v1058_v39 = vpop.f32.mrf.mxu2  ;;  %v962_v43 = vpop.f32.mrf.mxu0 }
 0x12e   : > { %v1107_v41 = vpop.f32.mrf.mxu3  ;;  %v1059_v42 = vadd.f32 %v1058_v39, %v1010_v38  ;;  %v1011_v44 = vpop.f32.mrf.mxu1  ;;  %v963_v46 = vadd.f32 %v2145_v32, %v962_v43 }
 0x130   : > { %v2241_v47 = vadd.f32 %v1107_v41, %v1059_v42  ;;  %v1012_v49 = vadd.f32 %v1011_v44, %v963_v46 }
 0x135   : > { %v1060_v59 = vpop.f32.mrf.mxu2  ;;  %v965_v0 = vpop.f32.mrf.mxu0 }
 0x136   : > { %v1109_v60 = vpop.f32.mrf.mxu3  ;;  %v1061_v63 = vadd.f32 %v1060_v59, %v1012_v49  ;;  %v1014_v1 = vpop.f32.mrf.mxu1  ;;  %v966_v6 = vadd.f32 %v2145_v32, %v965_v0 }
 0x138   : > { %v2252_v7 = vadd.f32 %v1109_v60, %v1061_v63  ;;  %v1015_v8 = vadd.f32 %v1014_v1, %v966_v6  ;;  %1160 = vmatmul.bf16.gmra.mxu0 %v401_v61 }
 0x139   : > { %1209 = vmatmul.bf16.gmra.mxu1 %v402_v62 }
 0x13a   : > { %1258 = vmatmul.bf16.gmra.mxu2 %v403_v2 }
 0x13b   : > { %1307 = vmatmul.bf16.gmra.mxu3 %v404_v4 }
 0x13d   : > { %v1063_v9 = vpop.f32.mrf.mxu2  ;;  %v967_v15 = vpop.f32.mrf.mxu0 }
 0x13e   : > { %v1112_v10 = vpop.f32.mrf.mxu3  ;;  %v1064_v12 = vadd.f32 %v1063_v9, %v1015_v8  ;;  %v1016_v16 = vpop.f32.mrf.mxu1  ;;  %v968_v17 = vadd.f32 %v2145_v32, %v967_v15 }
 0x140   : > { %v2255_v18 = vadd.f32 %v1112_v10, %v1064_v12  ;;  %v1017_v20 = vadd.f32 %v1016_v16, %v968_v17 }
 0x145   : > { %v1065_v21 = vpop.f32.mrf.mxu2  ;;  %v1126_v24 = vpop.f32.mrf.mxu0 }
 0x146   : > { %v1114_v22 = vpop.f32.mrf.mxu3  ;;  %v1066_v23 = vadd.f32 %v1065_v21, %v1017_v20  ;;  %v1175_v25 = vpop.f32.mrf.mxu1  ;;  %v1127_v29 = vadd.f32 %v1126_v24, %v2157_v55 }
 0x148   : > { %v2257_v26 = vadd.f32 %v1114_v22, %v1066_v23  ;;  %v1176_v33 = vadd.f32 %v1175_v25, %v1127_v29 }
 0x14d   : > { %v1224_v27 = vpop.f32.mrf.mxu2  ;;  %v1128_v30 = vpop.f32.mrf.mxu0 }
 0x14e   : > { %v1273_v28 = vpop.f32.mrf.mxu3  ;;  %v1177_v31 = vpop.f32.mrf.mxu1  ;;  %v1129_v32 = vadd.f32 %v1128_v30, %v2168_v11  ;;  %v1225_v34 = vadd.f32 %v1224_v27, %v1176_v33 }
 0x150   : > { %v1178_v35 = vadd.f32 %v1177_v31, %v1129_v32  ;;  %v1274_v44 = vadd.f32 %v1273_v28, %v1225_v34 }
 0x155   : > { %v1226_v38 = vpop.f32.mrf.mxu2  ;;  %v1131_v42 = vpop.f32.mrf.mxu0 }
 0x156   : > { %v1275_v39 = vpop.f32.mrf.mxu3  ;;  %v1227_v41 = vadd.f32 %v1226_v38, %v1178_v35  ;;  %v1180_v43 = vpop.f32.mrf.mxu1  ;;  %v1132_v50 = vadd.f32 %v1131_v42, %v2171_v19 }
 0x158   : > { %v1276_v46 = vadd.f32 %v1275_v39, %v1227_v41  ;;  %v1181_v54 = vadd.f32 %v1180_v43, %v1132_v50 }
 0x15a   : > { %v1763_v55 = vpack.c.bf16 %v1276_v46, %v1274_v44 }
 0x15c   : > { %1764 = vst [vmem:[%s2266_s10] sm:$0xff] %v1763_v55  }
 0x15d   : > { %v1229_v11 = vpop.f32.mrf.mxu2  ;;  %v1133_v51 = vpop.f32.mrf.mxu0 }
 0x15e   : > { %v1278_v49 = vpop.f32.mrf.mxu3  ;;  %v1182_v52 = vpop.f32.mrf.mxu1  ;;  %v1134_v53 = vadd.f32 %v1133_v51, %v2182_v40  ;;  %v1230_v56 = vadd.f32 %v1229_v11, %v1181_v54 }
 0x160   : > { %v1183_v57 = vadd.f32 %v1182_v52, %v1134_v53  ;;  %v1279_v63 = vadd.f32 %v1278_v49, %v1230_v56 }
 0x165   : > { %v1231_v58 = vpop.f32.mrf.mxu2  ;;  %v1136_v61 = vpop.f32.mrf.mxu0 }
 0x166   : > { %v1280_v59 = vpop.f32.mrf.mxu3  ;;  %v1232_v60 = vadd.f32 %v1231_v58, %v1183_v57  ;;  %v1185_v62 = vpop.f32.mrf.mxu1  ;;  %v1137_v19 = vadd.f32 %v1136_v61, %v2185_v48 }
 0x168   : > { %v1281_v0 = vadd.f32 %v1280_v59, %v1232_v60  ;;  %v1186_v9 = vadd.f32 %v1185_v62, %v1137_v19 }
 0x16a   : > { %v1768_v1 = vpack.c.bf16 %v1281_v0, %v1279_v63 }
 0x16c   : > { %1800 = vst [vmem:[%s2266_s10 + $0x8] sm:$0xff] %v1768_v1  }
 0x16d   : > { %v1234_v2 = vpop.f32.mrf.mxu2  ;;  %v1138_v6 = vpop.f32.mrf.mxu0 }
 0x16e   : > { %v1283_v4 = vpop.f32.mrf.mxu3  ;;  %v1187_v8 = vpop.f32.mrf.mxu1  ;;  %v1139_v40 = vadd.f32 %v1138_v6, %v2196_v5  ;;  %v1235_v10 = vadd.f32 %v1234_v2, %v1186_v9 }
 0x170   : > { %v1188_v12 = vadd.f32 %v1187_v8, %v1139_v40  ;;  %v1284_v22 = vadd.f32 %v1283_v4, %v1235_v10 }
 0x175   : > { %v1236_v15 = vpop.f32.mrf.mxu2  ;;  %v1141_v20 = vpop.f32.mrf.mxu0 }
 0x176   : > { %v1285_v16 = vpop.f32.mrf.mxu3  ;;  %v1237_v17 = vadd.f32 %v1236_v15, %v1188_v12  ;;  %v1190_v21 = vpop.f32.mrf.mxu1  ;;  %v1142_v48 = vadd.f32 %v1141_v20, %v2199_v14 }
 0x178   : > { %v1286_v23 = vadd.f32 %v1285_v16, %v1237_v17  ;;  %v1191_v30 = vadd.f32 %v1190_v21, %v1142_v48 }
 0x17a   : > { %v1773_v24 = vpack.c.bf16 %v1286_v23, %v1284_v22 }
 0x17c   : > { %1801 = vst [vmem:[%s2266_s10 + $0x10] sm:$0xff] %v1773_v24  }
 0x17d   : > { %v1239_v25 = vpop.f32.mrf.mxu2  ;;  %v1143_v28 = vpop.f32.mrf.mxu0 }
 0x17e   : > { %v1288_v27 = vpop.f32.mrf.mxu3  ;;  %v1192_v29 = vpop.f32.mrf.mxu1  ;;  %v1144_v5 = vadd.f32 %v1143_v28, %v2210_v36  ;;  %v1240_v31 = vadd.f32 %v1239_v25, %v1191_v30 }
 0x180   : > { %v1193_v32 = vadd.f32 %v1192_v29, %v1144_v5  ;;  %v1289_v41 = vadd.f32 %v1288_v27, %v1240_v31 }
 0x185   : > { %v1241_v33 = vpop.f32.mrf.mxu2  ;;  %v1146_v38 = vpop.f32.mrf.mxu0 }
 0x186   : > { %v1290_v34 = vpop.f32.mrf.mxu3  ;;  %v1242_v35 = vadd.f32 %v1241_v33, %v1193_v32  ;;  %v1195_v39 = vpop.f32.mrf.mxu1  ;;  %v1147_v14 = vadd.f32 %v1146_v38, %v2213_v45 }
 0x188   : > { %v1291_v42 = vadd.f32 %v1290_v34, %v1242_v35  ;;  %v1196_v49 = vadd.f32 %v1195_v39, %v1147_v14 }
 0x18a   : > { %v1778_v43 = vpack.c.bf16 %v1291_v42, %v1289_v41 }
 0x18c   : > { %1802 = vst [vmem:[%s2266_s10 + $0x18] sm:$0xff] %v1778_v43  }
 0x18d   : > { %v1244_v44 = vpop.f32.mrf.mxu2  ;;  %v1148_v55 = vpop.f32.mrf.mxu0 }
 0x18e   : > { %v1293_v46 = vpop.f32.mrf.mxu3  ;;  %v1197_v11 = vpop.f32.mrf.mxu1  ;;  %v1149_v36 = vadd.f32 %v1148_v55, %v2224_v3  ;;  %v1245_v50 = vadd.f32 %v1244_v44, %v1196_v49 }
 0x190   : > { %v1198_v51 = vadd.f32 %v1197_v11, %v1149_v36  ;;  %v1294_v58 = vadd.f32 %v1293_v46, %v1245_v50 }
 0x195   : > { %v1246_v52 = vpop.f32.mrf.mxu2  ;;  %v1151_v56 = vpop.f32.mrf.mxu0 }
 0x196   : > { %v1295_v53 = vpop.f32.mrf.mxu3  ;;  %v1247_v54 = vadd.f32 %v1246_v52, %v1198_v51  ;;  %v1200_v57 = vpop.f32.mrf.mxu1  ;;  %v1152_v45 = vadd.f32 %v1151_v56, %v2227_v13 }
 0x198   : > { %v1296_v59 = vadd.f32 %v1295_v53, %v1247_v54  ;;  %v1201_v1 = vadd.f32 %v1200_v57, %v1152_v45 }
 0x19a   : > { %v1783_v60 = vpack.c.bf16 %v1296_v59, %v1294_v58 }
 0x19c   : > { %1803 = vst [vmem:[%s2266_s10 + $0x20] sm:$0xff] %v1783_v60  }
 0x19d   : > { %v1249_v61 = vpop.f32.mrf.mxu2  ;;  %v1153_v63 = vpop.f32.mrf.mxu0 }
 0x19e   : > { %v1298_v62 = vpop.f32.mrf.mxu3  ;;  %v1202_v0 = vpop.f32.mrf.mxu1  ;;  %v1154_v3 = vadd.f32 %v1153_v63, %v2238_v37  ;;  %v1250_v2 = vadd.f32 %v1249_v61, %v1201_v1 }
 0x1a0   : > { %v1203_v4 = vadd.f32 %v1202_v0, %v1154_v3  ;;  %v1299_v10 = vadd.f32 %v1298_v62, %v1250_v2 }
 0x1a5   : > { %v1251_v19 = vpop.f32.mrf.mxu2  ;;  %v1156_v40 = vpop.f32.mrf.mxu0 }
 0x1a6   : > { %v1300_v6 = vpop.f32.mrf.mxu3  ;;  %v1252_v8 = vadd.f32 %v1251_v19, %v1203_v4  ;;  %v1205_v9 = vpop.f32.mrf.mxu1  ;;  %v1157_v13 = vadd.f32 %v1156_v40, %v2241_v47 }
 0x1a8   : > { %v1301_v12 = vadd.f32 %v1300_v6, %v1252_v8  ;;  %v1206_v22 = vadd.f32 %v1205_v9, %v1157_v13 }
 0x1aa   : > { %v1788_v15 = vpack.c.bf16 %v1301_v12, %v1299_v10 }
 0x1ac   : > { %1804 = vst [vmem:[%s2266_s10 + $0x28] sm:$0xff] %v1788_v15  }
 0x1ad   : > { %v1254_v16 = vpop.f32.mrf.mxu2  ;;  %v1158_v20 = vpop.f32.mrf.mxu0 }
 0x1ae   : > { %v1303_v17 = vpop.f32.mrf.mxu3  ;;  %v1207_v21 = vpop.f32.mrf.mxu1  ;;  %v1159_v37 = vadd.f32 %v1158_v20, %v2252_v7  ;;  %v1255_v23 = vadd.f32 %v1254_v16, %v1206_v22 }
 0x1b0   : > { %v1208_v24 = vadd.f32 %v1207_v21, %v1159_v37  ;;  %v1304_v29 = vadd.f32 %v1303_v17, %v1255_v23 }
 0x1b5   : > { %v1256_v25 = vpop.f32.mrf.mxu2  ;;  %v1161_v28 = vpop.f32.mrf.mxu0 }
 0x1b6   : > { %v1305_v27 = vpop.f32.mrf.mxu3  ;;  %v1257_v48 = vadd.f32 %v1256_v25, %v1208_v24  ;;  %v1210_v30 = vpop.f32.mrf.mxu1  ;;  %v1162_v47 = vadd.f32 %v1161_v28, %v2255_v18 }
 0x1b8   : > { %v1306_v5 = vadd.f32 %v1305_v27, %v1257_v48  ;;  %v1211_v35 = vadd.f32 %v1210_v30, %v1162_v47 }
 0x1ba   : > { %v1793_v31 = vpack.c.bf16 %v1306_v5, %v1304_v29 }
 0x1bc   : > { %1805 = vst [vmem:[%s2266_s10 + $0x30] sm:$0xff] %v1793_v31  }
 0x1bd   : > { %v1259_v32 = vpop.f32.mrf.mxu2  ;;  %v1163_v34 = vpop.f32.mrf.mxu0 }
 0x1be   : > { %v1308_v33 = vpop.f32.mrf.mxu3  ;;  %v1164_v7 = vadd.f32 %v1163_v34, %v2257_v26  ;;  %v1212_v38 = vpop.f32.mrf.mxu1  ;;  %v1260_v39 = vadd.f32 %v1259_v32, %v1211_v35 }
 0x1c0   : > { %v1213_v41 = vadd.f32 %v1212_v38, %v1164_v7  ;;  %v1309_v46 = vadd.f32 %v1308_v33, %v1260_v39 }
 0x1c5   : > { %v1261_v42 = vpop.f32.mrf.mxu2 }
 0x1c6   : > { %v1262_v43 = vadd.f32 %v1261_v42, %v1213_v41  ;;  %v1310_v44 = vpop.f32.mrf.mxu3 }
 0x1c8   : > { %v1311_v14 = vadd.f32 %v1310_v44, %v1262_v43 }
 0x1ca   : > { %v1798_v55 = vpack.c.bf16 %v1311_v14, %v1309_v46 }
 0x1cc   : > { %1806 = vst [vmem:[%s2266_s10 + $0x38] sm:$0xff] %v1798_v55  }
 0x1cd PF: > { %p14_p4 = scmp.ge.s32.totalorder %s2031_s25, 4   ;;  %s2311_s12 = smov %s1951_s13 }
 0x1ce   : > { %s2312_s13 = smov %s1955_s14  ;;  %s2313_s14 = smov %s2043_s30 }
 0x1cf   : > { %s2314_s15 = smov %s2031_s25  ;;  %16 = sbr.rel (!%p14_p4) target bundleno = 4 (0x4), region = 76 }
 0x1d4   :  { %1367 = vsyncpa [#allocation3], 1 }
 0x1d5   :  { %1369 = vsyncpa [#allocation3 + $0x1], 1 }
 0x1d6   :  { %1370 = vsyncpa [#allocation5], 1 }

</bundles_post_ra>
